<compile_context>
chip_gen: v7x
topology: tpu7x:2x2x1
jax: 0.10.0
libtpu: 0.0.40
codegen_flags: <defaults>
</compile_context>

<pallas_src>
import math

import jax
import jax.numpy as jnp
from jax.experimental import pallas as pl
from jax.experimental.pallas import tpu as pltpu


def _dyt_kernel(alpha_ref, gamma_ref, beta_ref, x_ref, o_ref):
    # alpha_ref: SMEM (1,) f32 scalar
    # gamma_ref/beta_ref: VMEM (1, lane), already in the affine compute dtype
    # x_ref / o_ref: VMEM (tile_rows, lane)
    a = alpha_ref[0]
    t = jnp.tanh(a * x_ref[...].astype(jnp.float32))      # tanh always in f32 (EUP)
    # (1, lane) broadcasts over the sublane axis against (tile_rows, lane).
    y = gamma_ref[...] * t.astype(gamma_ref.dtype) + beta_ref[...]
    o_ref[...] = y.astype(o_ref.dtype)


def _vmem_capacity_bytes():
    try:
        return int(pltpu.get_tpu_info().vmem_capacity_bytes)
    except Exception:
        return 64 << 20  # conservative fallback (v7x-sized)


def _supports_bf16_vector_math():
    # v5e has no bf16 VPU/EUP; keep the affine in f32 there.
    try:
        kind = jax.devices()[0].device_kind.lower()
    except Exception:
        return True
    return not any(tag in kind for tag in ("v5 lite", "v5e", "v5litepod"))


def dynamic_tanh(x, alpha, gamma, beta, *, tile_bytes=None,
                 vmem_limit_bytes=None, donate_x=False):
    """x: (batch, seq, n_embd); alpha: (1,); gamma, beta: (n_embd,)."""
    b, s, d = x.shape
    rows = b * s
    total = rows * d
    dtype = x.dtype
    itemsize = jnp.dtype(dtype).itemsize

    # --- lane-dense 2D layout (never pad + slice) --------------------------
    if d % 128 == 0:
        lane, r2, reps = d, rows, 1
    else:
        lane_lcm = d * 128 // math.gcd(d, 128)
        if lane_lcm <= 2048 and total % lane_lcm == 0:
            # zero-copy reshape into a (total/lane, lane) slab; gamma/beta
            # are tiled lane//d times so column c maps to feature c % d.
            lane = lane_lcm
            r2 = total // lane
            reps = lane // d
        else:
            # full-extent last dim (block dim == array dim is legal);
            # accept masked vst rather than paying pad/slice HBM round trips.
            lane, r2, reps = d, rows, 1

    x2 = x.reshape(r2, lane)

    # --- affine params: pre-cast once in the wrapper -----------------------
    if dtype == jnp.bfloat16 and _supports_bf16_vector_math():
        param_dtype = jnp.bfloat16      # affine + store in bf16 on v6e/v7x
    else:
        param_dtype = jnp.float32
    g1 = gamma.astype(param_dtype)
    b1 = beta.astype(param_dtype)
    if reps > 1:
        g1 = jnp.tile(g1, reps)
        b1 = jnp.tile(b1, reps)
    g2 = g1.reshape(1, lane)
    b2 = b1.reshape(1, lane)

    # --- per-generation tile sizing ----------------------------------------
    vmem_cap = _vmem_capacity_bytes()
    if tile_bytes is None:
        # ~2 MiB on 64 MiB-VMEM parts (v7x), ~4 MiB on 128 MiB parts; mem-bound
        # streaming is already at ~85% of HBM roofline by 1-4 MiB tiles.
        tile_bytes = max(1 << 20, min(4 << 20, vmem_cap // 32))

    sublane = {1: 32, 2: 16, 4: 8}.get(itemsize, 8)   # dtype sublane packing
    row_bytes = lane * itemsize
    desired = max(1, tile_bytes // row_bytes)
    # Keep >= 8 grid steps so double-buffering overlaps DMA with compute and
    # both v7x TensorCores get work under dimension_semantics=("parallel",).
    min_blocks = 8
    desired = min(desired, pl.cdiv(r2, min_blocks))
    tile_rows = max(sublane, (desired // sublane) * sublane)
    tile_rows = min(tile_rows, r2)                    # full extent if tiny
    grid = (pl.cdiv(r2, tile_rows),)                  # ragged last block is masked

    if vmem_limit_bytes is None:
        io_block = tile_rows * lane * itemsize
        f32_block = tile_rows * lane * 4
        # double-buffered in + out, plus f32 temporaries from the cast/tanh
        # chain, plus params + slack.
        need = 4 * io_block + 3 * f32_block + 2 * lane * 4 + (1 << 16)
        vmem_limit_bytes = min(max(2 * need, 16 << 20), (vmem_cap * 3) // 4)

    alpha32 = alpha.reshape(1).astype(jnp.float32)

    cost = pl.CostEstimate(
        flops=4 * total,
        transcendentals=total,
        bytes_accessed=2 * total * itemsize
        + 2 * lane * jnp.dtype(param_dtype).itemsize,
    )

    kwargs = dict(
        out_shape=jax.ShapeDtypeStruct((r2, lane), dtype),
        grid_spec=pltpu.PrefetchScalarGridSpec(
            num_scalar_prefetch=0,
            grid=grid,
            in_specs=[
                pl.BlockSpec(memory_space=pltpu.MemorySpace.SMEM),   # alpha
                pl.BlockSpec((1, lane), lambda i: (0, 0)),           # gamma row
                pl.BlockSpec((1, lane), lambda i: (0, 0)),           # beta row
                pl.BlockSpec((tile_rows, lane), lambda i: (i, 0)),   # x tile
            ],
            out_specs=pl.BlockSpec((tile_rows, lane), lambda i: (i, 0)),
        ),
        compiler_params=pltpu.CompilerParams(
            dimension_semantics=("parallel",),
            vmem_limit_bytes=int(vmem_limit_bytes),
        ),
        cost_estimate=cost,
    )
    if donate_x:
        # x2 is operand index 3 (alpha, gamma, beta, x); out shape/dtype match.
        kwargs["input_output_aliases"] = {3: 0}

    out2 = pl.pallas_call(_dyt_kernel, **kwargs)(alpha32, g2, b2, x2)
    return out2.reshape(b, s, d)


def _reference(x, alpha, gamma, beta):
    xf = x.astype(jnp.float32)
    y = gamma.astype(jnp.float32) * jnp.tanh(alpha[0].astype(jnp.float32) * xf) \
        + beta.astype(jnp.float32)
    return y.astype(x.dtype)


def _check(batch, seq, n_embd, key, dtype=jnp.float32, atol=1e-4, rtol=1e-4):
    init_alpha = 2.0
    k1, k2, k3 = jax.random.split(key, 3)
    alpha = jnp.ones((1,), jnp.float32) * init_alpha
    gamma = 1.0 + 0.1 * jax.random.normal(k1, (n_embd,), jnp.float32)
    beta = 0.1 * jax.random.normal(k2, (n_embd,), jnp.float32)
    x = jax.random.normal(k3, (batch, seq, n_embd), jnp.float32).astype(dtype)

    y = jax.block_until_ready(dynamic_tanh(x, alpha, gamma, beta))
    y_ref = _reference(x, alpha, gamma, beta)
    assert y.shape == (batch, seq, n_embd)
    assert y.dtype == dtype
    assert jnp.allclose(y.astype(jnp.float32), y_ref.astype(jnp.float32),
                        atol=atol, rtol=rtol), \
        f"mismatch for shape {(batch, seq, n_embd)} dtype {dtype}"


if __name__ == "__main__":
    key = jax.random.PRNGKey(0)
    k0, k1, k2, k3 = jax.random.split(key, 4)

    # primary small shape implied by the module: (batch, seq, n_embd)
    _check(batch=2, seq=8, n_embd=32, key=k0)    # lcm-slab path (lane=128)
    _check(batch=2, seq=8, n_embd=128, key=k1)   # direct (d % 128 == 0) path
    _check(batch=2, seq=8, n_embd=96, key=k2)    # lcm-slab path (lane=384), no pad
    # bf16 I/O path (affine in bf16 on v6e/v7x, f32 on v5e) — loose tolerance
    _check(batch=2, seq=8, n_embd=128, key=k3, dtype=jnp.bfloat16,
           atol=3e-2, rtol=3e-2)

    print("KERNEL_OK")
</pallas_src>

<mosaic_0001>
module attributes {stable_mosaic.version = 11 : i64} {
  func.func @_dyt_kernel(%arg0: i32, %arg1: memref<1xf32, #tpu.memory_space<smem>>, %arg2: memref<1x128xf32, #tpu.memory_space<vmem>>, %arg3: memref<1x128xf32, #tpu.memory_space<vmem>>, %arg4: memref<4x128xf32, #tpu.memory_space<vmem>>, %arg5: memref<4x128xf32, #tpu.memory_space<vmem>>) attributes {dimension_semantics = [#tpu.dimension_semantics<parallel>], iteration_bounds = array<i64: 1>, scalar_prefetch = 0 : i64, scratch_operands = 0 : i64, tpu.core_type = #tpu.core_type<tc>, window_params = [{transform_indices = @transform_0, window_bounds = array<i64: 1>}, {pipeline_mode = #tpu.pipeline_mode<synchronous>, transform_indices = @transform_1, window_bounds = array<i64: 1, 128>}, {pipeline_mode = #tpu.pipeline_mode<synchronous>, transform_indices = @transform_2, window_bounds = array<i64: 1, 128>}, {transform_indices = @transform_3, window_bounds = array<i64: 4, 128>}, {transform_indices = @transform_4, window_bounds = array<i64: 4, 128>}]} {
    %c0 = arith.constant 0 : index
    %0 = memref.load %arg1[%c0] : memref<1xf32, #tpu.memory_space<smem>>
    %c0_0 = arith.constant 0 : index
    %c0_1 = arith.constant 0 : index
    %1 = vector.load %arg4[%c0_0, %c0_1] : memref<4x128xf32, #tpu.memory_space<vmem>>, vector<4x128xf32>
    %2 = vector.broadcast %0 : f32 to vector<4x128xf32>
    %3 = arith.mulf %2, %1 : vector<4x128xf32>
    %4 = math.tanh %3 : vector<4x128xf32>
    %c0_2 = arith.constant 0 : index
    %c0_3 = arith.constant 0 : index
    %5 = vector.load %arg2[%c0_2, %c0_3] : memref<1x128xf32, #tpu.memory_space<vmem>>, vector<1x128xf32>
    %6 = vector.broadcast %5 : vector<1x128xf32> to vector<4x128xf32>
    %7 = arith.mulf %6, %4 : vector<4x128xf32>
    %c0_4 = arith.constant 0 : index
    %c0_5 = arith.constant 0 : index
    %8 = vector.load %arg3[%c0_4, %c0_5] : memref<1x128xf32, #tpu.memory_space<vmem>>, vector<1x128xf32>
    %9 = vector.broadcast %8 : vector<1x128xf32> to vector<4x128xf32>
    %10 = arith.addf %7, %9 : vector<4x128xf32>
    %c0_6 = arith.constant 0 : index
    %c0_7 = arith.constant 0 : index
    %11 = vector.load %arg5[%c0_6, %c0_7] : memref<4x128xf32, #tpu.memory_space<vmem>>, vector<4x128xf32>
    tpu.vector_store %arg5[%c0_6, %c0_7], %10 {strides = array<i32>} : memref<4x128xf32, #tpu.memory_space<vmem>>, vector<4x128xf32>,
    return
  }
  func.func @transform_0(%arg0: i32) -> i32 {
    %c0_i32 = arith.constant 0 : i32
    %c0_i32_0 = arith.constant 0 : i32
    return %c0_i32 : i32
  }
  func.func @transform_1(%arg0: i32) -> (i32, i32) {
    %c0_i32 = arith.constant 0 : i32
    %c0_i32_0 = arith.constant 0 : i32
    %c0_i32_1 = arith.constant 0 : i32
    return %c0_i32, %c0_i32_0 : i32, i32
  }
  func.func @transform_2(%arg0: i32) -> (i32, i32) {
    %c0_i32 = arith.constant 0 : i32
    %c0_i32_0 = arith.constant 0 : i32
    %c0_i32_1 = arith.constant 0 : i32
    return %c0_i32, %c0_i32_0 : i32, i32
  }
  func.func @transform_3(%arg0: i32) -> (i32, i32) {
    %c0_i32 = arith.constant 0 : i32
    %c0_i32_0 = arith.constant 0 : i32
    return %arg0, %c0_i32 : i32, i32
  }
  func.func @transform_4(%arg0: i32) -> (i32, i32) {
    %c0_i32 = arith.constant 0 : i32
    %c0_i32_0 = arith.constant 0 : i32
    return %arg0, %c0_i32 : i32, i32
  }
}

</mosaic_0001>

<bundles_post_ra>
// kernel: tpu_custom_call.1
= control target key start
LH: loop header
LB: loop body
LE: loop exit
PB: predicated region body
PF: predicated region fallthrough
CT: control target
= control target key end

     0   :  { %s134_s0 = inlined_call_operand.<no memory space> [shape: f32[1], index: 0, kind: input, shape index: {}]   ;;  %s135_s1 = inlined_call_operand.vmem [shape: f32[1,128], index: 1, kind: input, shape index: {}]   ;;  %s136_s2 = inlined_call_operand.vmem [shape: f32[1,128], index: 2, kind: input, shape index: {}]   ;;  %s137_s3 = inlined_call_operand.vmem [shape: f32[4,128], index: 3, kind: input, shape index: {}]   ;;  %s138_s4 = inlined_call_operand.hbm [shape: f32[4,128], index: 4, kind: output, shape index: {}]  }
   0x1   :  { %v20_v0 = vld [vmem:[%s137_s3] sm:$0xf]  ;;  %v21_v1 = vstv %s134_s0 }
   0x2   :  { %v22_v2 = vmul.f32 %v21_v1, %v20_v0 }
   0x3   :  { %10 = vsyncpa [#allocation4], 0  ;;  %v55_v3 = vld [vmem:[%s135_s1] ss:$0 sm:$0xff]  ;;  %s84_s23 = smov [#allocation3]  }
   0x4   :  { %58 = vtanh.f32 %v22_v2  ;;  %v56_v5 = vld [vmem:[%s136_s2] ss:$0 sm:$0xff]  ;;  %s47_s24 = sshll.u32 %s84_s23, 4  ;;  %s48_s24 = int_to_ptr.vmem [resolvable:$true] %s47_s24 }
   0x5   :  { %s60_s3 = scalar_lea.vmem %s48_s24, 64  ;;  %p65_p1 = scmp.lt.s32.totalorder %s48_s24, %s48_s24 }
   0x6   :  { %p61_p0 = scmp.ne.s32.totalorder %s48_s24, %s60_s3  ;;  %p66_p2 = scmp.lt.s32.totalorder %s60_s3, %s60_s3 }
   0x8   :  { %p67_p3 = por %p66_p2, %p65_p1 }
   0xa   :  { %p68_p4 = pnand %p67_p3, %p61_p0 }
   0xe   :  { %v59_v4 = vpop.eup %58 }
   0xf   :  { %v31_v6 = vmul.f32 %v59_v4, %v55_v3 }
  0x11   :  { %v39_v7 = vadd.f32 %v56_v5, %v31_v6 }
  0x13   :  { %40 = vst [vmem:[#allocation3] sm:$0xf] %v39_v7 }
  0x14   :  { %71 = shalt.err (!%p68_p4)
}
  0x15   :  { %s72_s25 = scalar_lea.hbm %s138_s4, 64 }
  0x16   :  { %p73_p5 = scmp.ne.s32.totalorder %s138_s4, %s72_s25  ;;  %p76_p6 = scmp.lt.u32.totalorder %s72_s25, %s138_s4 }
  0x18   :  { %p78_p7 = pnand %p76_p6, %p73_p5 }
  0x1a   :  { %81 = shalt.err (!%p78_p7)
}
  0x1b   :  { %50 = dma.vmem_to_hbm [thread:$0]  %s48_s24, 64, %s138_s4, [#allocation4]  }
  0x1c   :  { %82 = dma.done.wait [#allocation4], 64  }
  0x1d   :  { %83 = vsyncadd [#allocation4], 4294967232 }
  0x1e   :  { %54 = vsyncpa [#allocation4], 1 }

</bundles_post_ra>
